<compile_context>
chip_gen: v6e
topology: v6e:2x2x1
jax: 0.10.0
libtpu: 0.0.40
codegen_flags: <defaults>
</compile_context>

<pallas_src>
import jax
import jax.numpy as jnp
from jax.experimental import pallas as pl
from jax.experimental.pallas import tpu as pltpu


def _round_up(x, m):
    return (x + m - 1) // m * m


def _round_down(x, m):
    return max(m, x // m * m)


def _classifier_kernel(x_ref, w_ref, b_ref, o_ref):
    # x_ref: (TM, D); w_ref: (D, L_pad)  [canonical (M,K)x(K,N) MXU feed];
    # b_ref: (1, L_pad) f32; o_ref: (TM, L_pad).
    acc = jnp.dot(x_ref[...], w_ref[...], preferred_element_type=jnp.float32)
    o_ref[...] = (acc + b_ref[...]).astype(o_ref.dtype)


def prepare_classifier_params(weight, bias):
    """One-time parameter prep (hoisted out of the per-forward-call path).

    weight: (L, D) PyTorch nn.Linear layout; bias: (L,).
    Returns (w_p, b_p, L) with w_p: (D, L_pad), b_p: (1, L_pad) f32.
    The transpose is folded into the same copy that does the lane padding, so
    the per-call path never touches the raw (L, D) weight again.
    """
    L, D = weight.shape
    L_pad = _round_up(max(L, 128), 128)
    if L_pad == L:
        w_p = weight.T
    else:
        w_p = jnp.zeros((D, L_pad), weight.dtype).at[:, :L].set(weight.T)
    b_p = jnp.zeros((1, L_pad), jnp.float32).at[0, :L].set(bias.astype(jnp.float32))
    return w_p, b_p, L


def _choose_tile_and_vmem(B, D, L_pad, x_itemsize, w_itemsize, out_itemsize):
    # VMEM residents:
    #   weight (single-buffered, grid-invariant): D * L_pad * w_itemsize
    #   bias   (single-buffered):                 L_pad * 4
    #   x      (double-buffered):                 2 * TM * D * x_itemsize
    #   out    (double-buffered):                 2 * TM * L_pad * out_itemsize
    # Target ~48 MiB total: safely inside v7x's 64 MiB physical VMEM and well
    # under v5e/v6e's 128 MiB (the limit is passed explicitly below).
    VMEM_TARGET = 48 * 1024 * 1024
    fixed = D * L_pad * w_itemsize + L_pad * 4
    per_row = 2 * D * x_itemsize + 2 * L_pad * out_itemsize
    tm_budget = max(8, (VMEM_TARGET - fixed) // per_row)

    TM = min(1024, tm_budget, _round_up(B, 8))

    # v7x: guarantee >= 2 grid steps so both TensorCores get work (the
    # "parallel" axis only helps with >= 2 steps); no-op on 1-TC v5e/v6e.
    if B > 8:
        TM = min(TM, _round_up(pl.cdiv(B, 2), 8))

    # Align the tile to the MXU pass shape: 256 (v6e/v7x) when affordable,
    # 128 (v5e MXU width) mid-range, otherwise sublane granularity.
    if TM >= 512:
        TM = _round_down(TM, 256)
    elif TM >= 128:
        TM = _round_down(TM, 128)
    else:
        TM = _round_down(TM, 8)

    used = fixed + TM * per_row
    # Explicit scoped-VMEM limit: actual use + headroom, floored at the 16 MiB
    # v5e default and capped below v7x's 64 MiB physical VMEM so the same
    # number is valid on every generation.
    vmem_limit = int(min(64 * 1024 * 1024, max(used + 4 * 1024 * 1024,
                                               16 * 1024 * 1024)))
    return TM, vmem_limit


def classifier_forward(x, w_p, b_p, num_labels=None, *, slice_output=True):
    """x: (B, D); (w_p, b_p) from prepare_classifier_params. Returns (B, L)."""
    B, D = x.shape
    L_pad = w_p.shape[1]
    L = num_labels if num_labels is not None else L_pad

    TM, vmem_limit = _choose_tile_and_vmem(
        B, D, L_pad, x.dtype.itemsize, w_p.dtype.itemsize, x.dtype.itemsize)

    grid = (pl.cdiv(B, TM),)

    def build(single_buffer_invariants):
        # Grid-invariant weight/bias: index_map is constant, so a single VMEM
        # buffer suffices (saves D*L_pad*itemsize vs. default double-buffering).
        inv_kwargs = ({"pipeline_mode": pl.Buffered(1)}
                      if single_buffer_invariants else {})
        return pl.pallas_call(
            _classifier_kernel,
            out_shape=jax.ShapeDtypeStruct((B, L_pad), x.dtype),
            grid_spec=pltpu.PrefetchScalarGridSpec(
                num_scalar_prefetch=0,
                grid=grid,
                in_specs=[
                    pl.BlockSpec((TM, D), lambda i: (i, 0)),
                    pl.BlockSpec((D, L_pad), lambda i: (0, 0), **inv_kwargs),
                    pl.BlockSpec((1, L_pad), lambda i: (0, 0), **inv_kwargs),
                ],
                out_specs=pl.BlockSpec((TM, L_pad), lambda i: (i, 0)),
            ),
            compiler_params=pltpu.CompilerParams(
                dimension_semantics=("parallel",),
                vmem_limit_bytes=vmem_limit,
            ),
        )

    try:
        out_padded = build(True)(x, w_p, b_p)
    except Exception:
        # Fallback if this JAX build rejects single-buffered invariant operands;
        # numerics are identical, only VMEM footprint differs.
        out_padded = build(False)(x, w_p, b_p)

    if slice_output and L != L_pad:
        # NOTE: this slice is an extra HBM pass over the output; consumers that
        # can work on the (B, L_pad) slab (padded columns equal the bias) should
        # pass slice_output=False and fuse the slice downstream.
        return out_padded[:, :L]
    return out_padded


if __name__ == "__main__":
    key = jax.random.PRNGKey(0)
    kx, kw, kb = jax.random.split(key, 3)

    batch, input_dim, num_labels = 8, 32, 4

    x = jax.random.normal(kx, (batch, input_dim), dtype=jnp.float32)
    # Deterministic parameter init (matches nn.Linear's shapes: W (L, D), b (L,))
    bound = float(input_dim) ** -0.5
    weight = jax.random.uniform(kw, (num_labels, input_dim),
                                minval=-bound, maxval=bound, dtype=jnp.float32)
    bias = jax.random.uniform(kb, (num_labels,),
                              minval=-bound, maxval=bound, dtype=jnp.float32)

    # One-time parameter prep (padding + transpose hoisted out of the forward).
    w_p, b_p, L = prepare_classifier_params(weight, bias)

    out = classifier_forward(x, w_p, b_p, L)
    jax.block_until_ready(out)

    # Reference check against plain JAX (dropout is identity in eval mode).
    ref = x @ weight.T + bias
    assert out.shape == (batch, num_labels)
    assert jnp.allclose(out, ref, atol=1e-5, rtol=1e-5)

    print("KERNEL_OK")
</pallas_src>

<mosaic_0001>
module attributes {stable_mosaic.version = 11 : i64} {
  func.func @_classifier_kernel(%arg0: i32, %arg1: memref<8x32xf32, #tpu.memory_space<vmem>>, %arg2: memref<32x128xf32, #tpu.memory_space<vmem>>, %arg3: memref<1x128xf32, #tpu.memory_space<vmem>>, %arg4: memref<8x128xf32, #tpu.memory_space<vmem>>) attributes {dimension_semantics = [#tpu.dimension_semantics<parallel>], iteration_bounds = array<i64: 1>, scalar_prefetch = 0 : i64, scratch_operands = 0 : i64, tpu.core_type = #tpu.core_type<tc>, window_params = [{transform_indices = @transform_0, window_bounds = array<i64: 8, 32>}, {pipeline_mode = #tpu.pipeline_mode<synchronous>, transform_indices = @transform_1, window_bounds = array<i64: 32, 128>}, {pipeline_mode = #tpu.pipeline_mode<synchronous>, transform_indices = @transform_2, window_bounds = array<i64: 1, 128>}, {transform_indices = @transform_3, window_bounds = array<i64: 8, 128>}]} {
    %c0 = arith.constant 0 : index
    %c0_0 = arith.constant 0 : index
    %0 = vector.load %arg1[%c0, %c0_0] : memref<8x32xf32, #tpu.memory_space<vmem>>, vector<8x32xf32>
    %c0_1 = arith.constant 0 : index
    %c0_2 = arith.constant 0 : index
    %1 = vector.load %arg2[%c0_1, %c0_2] : memref<32x128xf32, #tpu.memory_space<vmem>>, vector<32x128xf32>
    %cst = arith.constant dense<0.000000e+00> : vector<8x128xf32>
    %2 = tpu.matmul %0, %1, %cst {dimension_numbers = #tpu.dot_dimension_numbers<[1], [0], [0], [1], [0, 0, 1, 1], [], []>} : vector<8x32xf32>, vector<32x128xf32>, vector<8x128xf32> -> vector<8x128xf32>
    %c0_3 = arith.constant 0 : index
    %c0_4 = arith.constant 0 : index
    %3 = vector.load %arg3[%c0_3, %c0_4] : memref<1x128xf32, #tpu.memory_space<vmem>>, vector<1x128xf32>
    %4 = vector.broadcast %3 : vector<1x128xf32> to vector<8x128xf32>
    %5 = arith.addf %2, %4 : vector<8x128xf32>
    %c0_5 = arith.constant 0 : index
    %c0_6 = arith.constant 0 : index
    %6 = vector.load %arg4[%c0_5, %c0_6] : memref<8x128xf32, #tpu.memory_space<vmem>>, vector<8x128xf32>
    tpu.vector_store %arg4[%c0_5, %c0_6], %5 {strides = array<i32>} : memref<8x128xf32, #tpu.memory_space<vmem>>, vector<8x128xf32>,
    return
  }
  func.func @transform_0(%arg0: i32) -> (i32, i32) {
    %c0_i32 = arith.constant 0 : i32
    %c0_i32_0 = arith.constant 0 : i32
    return %arg0, %c0_i32 : i32, i32
  }
  func.func @transform_1(%arg0: i32) -> (i32, i32) {
    %c0_i32 = arith.constant 0 : i32
    %c0_i32_0 = arith.constant 0 : i32
    %c0_i32_1 = arith.constant 0 : i32
    return %c0_i32, %c0_i32_0 : i32, i32
  }
  func.func @transform_2(%arg0: i32) -> (i32, i32) {
    %c0_i32 = arith.constant 0 : i32
    %c0_i32_0 = arith.constant 0 : i32
    %c0_i32_1 = arith.constant 0 : i32
    return %c0_i32, %c0_i32_0 : i32, i32
  }
  func.func @transform_3(%arg0: i32) -> (i32, i32) {
    %c0_i32 = arith.constant 0 : i32
    %c0_i32_0 = arith.constant 0 : i32
    return %arg0, %c0_i32 : i32, i32
  }
}

module attributes {stable_mosaic.version = 11 : i64} {
  func.func @_classifier_kernel(%arg0: i32, %arg1: memref<8x32xf32, #tpu.memory_space<vmem>>, %arg2: memref<32x128xf32, #tpu.memory_space<vmem>>, %arg3: memref<1x128xf32, #tpu.memory_space<vmem>>, %arg4: memref<8x128xf32, #tpu.memory_space<vmem>>) attributes {dimension_semantics = [#tpu.dimension_semantics<parallel>], iteration_bounds = array<i64: 1>, scalar_prefetch = 0 : i64, scratch_operands = 0 : i64, tpu.core_type = #tpu.core_type<tc>, window_params = [{transform_indices = @transform_0, window_bounds = array<i64: 8, 32>}, {pipeline_mode = #tpu.pipeline_mode<synchronous>, transform_indices = @transform_1, window_bounds = array<i64: 32, 128>}, {pipeline_mode = #tpu.pipeline_mode<synchronous>, transform_indices = @transform_2, window_bounds = array<i64: 1, 128>}, {transform_indices = @transform_3, window_bounds = array<i64: 8, 128>}]} {
    %c0 = arith.constant 0 : index
    %c0_0 = arith.constant 0 : index
    %0 = vector.load %arg1[%c0, %c0_0] : memref<8x32xf32, #tpu.memory_space<vmem>>, vector<8x32xf32>
    %c0_1 = arith.constant 0 : index
    %c0_2 = arith.constant 0 : index
    %1 = vector.load %arg2[%c0_1, %c0_2] : memref<32x128xf32, #tpu.memory_space<vmem>>, vector<32x128xf32>
    %cst = arith.constant dense<0.000000e+00> : vector<8x128xf32>
    %2 = tpu.matmul %0, %1, %cst {dimension_numbers = #tpu.dot_dimension_numbers<[1], [0], [0], [1], [0, 0, 1, 1], [], []>} : vector<8x32xf32>, vector<32x128xf32>, vector<8x128xf32> -> vector<8x128xf32>
    %c0_3 = arith.constant 0 : index
    %c0_4 = arith.constant 0 : index
    %3 = vector.load %arg3[%c0_3, %c0_4] : memref<1x128xf32, #tpu.memory_space<vmem>>, vector<1x128xf32>
    %4 = vector.broadcast %3 : vector<1x128xf32> to vector<8x128xf32>
    %5 = arith.addf %2, %4 : vector<8x128xf32>
    %c0_5 = arith.constant 0 : index
    %c0_6 = arith.constant 0 : index
    %6 = vector.load %arg4[%c0_5, %c0_6] : memref<8x128xf32, #tpu.memory_space<vmem>>, vector<8x128xf32>
    tpu.vector_store %arg4[%c0_5, %c0_6], %5 {strides = array<i32>} : memref<8x128xf32, #tpu.memory_space<vmem>>, vector<8x128xf32>,
    return
  }
  func.func @transform_0(%arg0: i32) -> (i32, i32) {
    %c0_i32 = arith.constant 0 : i32
    %c0_i32_0 = arith.constant 0 : i32
    return %arg0, %c0_i32 : i32, i32
  }
  func.func @transform_1(%arg0: i32) -> (i32, i32) {
    %c0_i32 = arith.constant 0 : i32
    %c0_i32_0 = arith.constant 0 : i32
    %c0_i32_1 = arith.constant 0 : i32
    return %c0_i32, %c0_i32_0 : i32, i32
  }
  func.func @transform_2(%arg0: i32) -> (i32, i32) {
    %c0_i32 = arith.constant 0 : i32
    %c0_i32_0 = arith.constant 0 : i32
    %c0_i32_1 = arith.constant 0 : i32
    return %c0_i32, %c0_i32_0 : i32, i32
  }
  func.func @transform_3(%arg0: i32) -> (i32, i32) {
    %c0_i32 = arith.constant 0 : i32
    %c0_i32_0 = arith.constant 0 : i32
    return %arg0, %c0_i32 : i32, i32
  }
}

</mosaic_0001>

<bundles_post_ra>
// kernel: tpu_custom_call.1
= control target key start
LH: loop header
LB: loop body
LE: loop exit
PB: predicated region body
PF: predicated region fallthrough
CT: control target
= control target key end

     0   :  { %8 = vsyncpa [#allocation3], 0  ;;  %s274_s0 = inlined_call_operand.hbm [shape: f32[8,32], index: 0, kind: input, shape index: {}]   ;;  %s275_s1 = inlined_call_operand.hbm [shape: f32[32,128], index: 1, kind: input, shape index: {}]   ;;  %s276_s2 = inlined_call_operand.vmem [shape: f32[1,128], index: 2, kind: input, shape index: {}]   ;;  %s277_s3 = inlined_call_operand.hbm [shape: f32[8,128], index: 3, kind: output, shape index: {}]  }
   0x1   :  { %9 = vsyncpa [#allocation6], 0 }
   0x2   :  { %10 = vsyncpa [#allocation4], 0  ;;  %s235_s12 = smov [#allocation2]   ;;  %s236_s14 = smov [#allocation5]  }
   0x3   :  { %s17_s13 = sshll.u32 %s235_s12, 4  ;;  %s26_s15 = sshll.u32 %s236_s14, 4  ;;  %s18_s13 = int_to_ptr.vmem [resolvable:$true] %s17_s13  ;;  %s27_s15 = int_to_ptr.vmem [resolvable:$true] %s26_s15 }
   0x4   :  { %s177_s16 = scalar_lea.vmem %s18_s13, 128  ;;  %p182_p1 = scmp.lt.s32.totalorder %s18_s13, %s18_s13 }
   0x5   :  { %p178_p0 = scmp.ne.s32.totalorder %s18_s13, %s177_s16  ;;  %p183_p2 = scmp.lt.s32.totalorder %s177_s16, %s177_s16 }
   0x7   :  { %p184_p3 = por %p183_p2, %p182_p1 }
   0x9   :  { %p185_p4 = pnand %p184_p3, %p178_p0 }
   0xb   :  { %188 = shalt.err (!%p185_p4)
}
   0xc   :  { %20 = dma.hbm_to_vmem [thread:$0]  %s274_s0, 128, %s18_s13, [#allocation3]  }
   0xd   :  { %s197_s19 = scalar_lea.vmem %s27_s15, 512  ;;  %p202_p6 = scmp.lt.s32.totalorder %s27_s15, %s27_s15 }
   0xe   :  { %p198_p5 = scmp.ne.s32.totalorder %s27_s15, %s197_s19  ;;  %p203_p7 = scmp.lt.s32.totalorder %s197_s19, %s197_s19 }
  0x10   :  { %p204_p8 = por %p203_p7, %p202_p6 }
  0x12   :  { %p205_p9 = pnand %p204_p8, %p198_p5 }
  0x14   :  { %208 = shalt.err (!%p205_p9)
}
  0x15   :  { %s237_s20 = smov 128   ;;  %s238_s21 = smov 8  }
  0x16   :  { %32 = dma.hbm_to_vmem [thread:$0]  %s275_s1, 512, %s27_s15, [#allocation6], %s237_s20, %s237_s20, %s238_s21  }
  0x17   :  { %229 = dma.done.wait [#allocation3], 128  }
  0x18   :  { %230 = vsyncadd [#allocation3], 4294967168 }
  0x19   :  { %231 = dma.done.wait [#allocation6], 512  }
  0x1a   :  { %232 = vsyncadd [#allocation6], 4294966784  ;;  %v239_v0 = vmov 0.0   ;;  %vm240_vm0 = vmmov 0   ;;  %v45_v1 = vld [vmem:[#allocation5 + $0x18] sm:$0xff]  ;;  %v44_v2 = vld [vmem:[#allocation5 + $0x10] sm:$0xff] }
  0x1b   :  { %151 = vmatprep.subr.mxu0 %v239_v0  ;;  %159 = vmatprep.mubr.msk.f32.mxu0 %vm240_vm0, %v239_v0  ;;  %v43_v3 = vld [vmem:[#allocation5 + $0x8] sm:$0xff]  ;;  %v42_v4 = vld [vmem:[#allocation5] sm:$0xff]  ;;  %v41_v5 = vld [vmem:[#allocation2] sm:$0xff]  ;;  %vm53_vm1 = vcmask 261120   ;;  %s241_s24 = smov [#allocation7]  }
  0x1c   :  { %152 = vmatpush3.msra.mxu0 %v45_v1  ;;  %v144_v6 = vld [vmem:[%s276_s2] ss:$0 sm:$0xff]  ;;  %s134_s25 = sshll.u32 %s241_s24, 4  ;;  %s135_s25 = int_to_ptr.vmem [resolvable:$true] %s134_s25 }
  0x1d   :  { %153 = vmatprep.subr.mxu0 %v239_v0  ;;  %s209_s26 = scalar_lea.vmem %s135_s25, 128  ;;  %p214_p11 = scmp.lt.s32.totalorder %s135_s25, %s135_s25 }
  0x1e   :  { %154 = vmatpush3.msra.mxu0 %v44_v2  ;;  %p210_p10 = scmp.ne.s32.totalorder %s135_s25, %s209_s26  ;;  %p215_p12 = scmp.lt.s32.totalorder %s209_s26, %s209_s26 }
  0x1f   :  { %155 = vmatprep.subr.mxu0 %v239_v0 }
  0x20   :  { %156 = vmatpush3.msra.mxu0 %v43_v3  ;;  %p216_p13 = por %p215_p12, %p214_p11 }
  0x21   :  { %157 = vmatprep.subr.mxu0 %v239_v0 }
  0x22   :  { %158 = vmatpush3.msra.mxu0 %v42_v4  ;;  %p217_p0 = pnand %p216_p13, %p210_p10 }
  0x23   :  { %160 = vmatmul.mubr.msk.f32.vlgmr.msra.gmra.mxu0 %vm53_vm1, %v41_v5 }
  0xe3   :  { %v123_v7 = vpop.f32.mrf.mxu0 }
  0xe4   :  { %v124_v8 = vadd.f32 %v144_v6, %v123_v7 }
  0xe5   :  { %v161_v9 = vpop.f32.mrf.mxu0 }
  0xe6   :  { %127 = vst [vmem:[#allocation7] sm:$0xff] %v124_v8 }
  0xe7   :  { %220 = shalt.err (!%p217_p0)
}
  0xe8   :  { %137 = dma.vmem_to_hbm [thread:$0]  %s135_s25, 128, %s277_s3, [#allocation4]  }
  0xe9   :  { %233 = dma.done.wait [#allocation4], 128  }
  0xea   :  { %234 = vsyncadd [#allocation4], 4294967168 }
  0xeb   :  { %141 = vsyncpa [#allocation3], 1 }
  0xec   :  { %142 = vsyncpa [#allocation6], 1 }
  0xed   :  { %143 = vsyncpa [#allocation4], 1 }

// kernel: tpu_custom_call.1
= control target key start
LH: loop header
LB: loop body
LE: loop exit
PB: predicated region body
PF: predicated region fallthrough
CT: control target
= control target key end

     0   :  { %8 = vsyncpa [#allocation3], 0  ;;  %s274_s0 = inlined_call_operand.hbm [shape: f32[8,32], index: 0, kind: input, shape index: {}]   ;;  %s275_s1 = inlined_call_operand.hbm [shape: f32[32,128], index: 1, kind: input, shape index: {}]   ;;  %s276_s2 = inlined_call_operand.vmem [shape: f32[1,128], index: 2, kind: input, shape index: {}]   ;;  %s277_s3 = inlined_call_operand.hbm [shape: f32[8,128], index: 3, kind: output, shape index: {}]  }
   0x1   :  { %9 = vsyncpa [#allocation6], 0 }
   0x2   :  { %10 = vsyncpa [#allocation4], 0  ;;  %s235_s12 = smov [#allocation2]   ;;  %s236_s14 = smov [#allocation5]  }
   0x3   :  { %s17_s13 = sshll.u32 %s235_s12, 4  ;;  %s26_s15 = sshll.u32 %s236_s14, 4  ;;  %s18_s13 = int_to_ptr.vmem [resolvable:$true] %s17_s13  ;;  %s27_s15 = int_to_ptr.vmem [resolvable:$true] %s26_s15 }
   0x4   :  { %s177_s16 = scalar_lea.vmem %s18_s13, 128  ;;  %p182_p1 = scmp.lt.s32.totalorder %s18_s13, %s18_s13 }
   0x5   :  { %p178_p0 = scmp.ne.s32.totalorder %s18_s13, %s177_s16  ;;  %p183_p2 = scmp.lt.s32.totalorder %s177_s16, %s177_s16 }
   0x7   :  { %p184_p3 = por %p183_p2, %p182_p1 }
   0x9   :  { %p185_p4 = pnand %p184_p3, %p178_p0 }
   0xb   :  { %188 = shalt.err (!%p185_p4)
}
   0xc   :  { %20 = dma.hbm_to_vmem [thread:$0]  %s274_s0, 128, %s18_s13, [#allocation3]  }
   0xd   :  { %s197_s19 = scalar_lea.vmem %s27_s15, 512  ;;  %p202_p6 = scmp.lt.s32.totalorder %s27_s15, %s27_s15 }
   0xe   :  { %p198_p5 = scmp.ne.s32.totalorder %s27_s15, %s197_s19  ;;  %p203_p7 = scmp.lt.s32.totalorder %s197_s19, %s197_s19 }
  0x10   :  { %p204_p8 = por %p203_p7, %p202_p6 }
  0x12   :  { %p205_p9 = pnand %p204_p8, %p198_p5 }
  0x14   :  { %208 = shalt.err (!%p205_p9)
}
  0x15   :  { %s237_s20 = smov 128   ;;  %s238_s21 = smov 8  }
  0x16   :  { %32 = dma.hbm_to_vmem [thread:$0]  %s275_s1, 512, %s27_s15, [#allocation6], %s237_s20, %s237_s20, %s238_s21  }
  0x17   :  { %229 = dma.done.wait [#allocation3], 128  }
  0x18   :  { %230 = vsyncadd [#allocation3], 4294967168 }
  0x19   :  { %231 = dma.done.wait [#allocation6], 512  }
  0x1a   :  { %232 = vsyncadd [#allocation6], 4294966784  ;;  %v239_v0 = vmov 0.0   ;;  %vm240_vm0 = vmmov 0   ;;  %v45_v1 = vld [vmem:[#allocation5 + $0x18] sm:$0xff]  ;;  %v44_v2 = vld [vmem:[#allocation5 + $0x10] sm:$0xff] }
  0x1b   :  { %151 = vmatprep.subr.mxu0 %v239_v0  ;;  %159 = vmatprep.mubr.msk.f32.mxu0 %vm240_vm0, %v239_v0  ;;  %v43_v3 = vld [vmem:[#allocation5 + $0x8] sm:$0xff]  ;;  %v42_v4 = vld [vmem:[#allocation5] sm:$0xff]  ;;  %v41_v5 = vld [vmem:[#allocation2] sm:$0xff]  ;;  %vm53_vm1 = vcmask 261120   ;;  %s241_s24 = smov [#allocation7]  }
  0x1c   :  { %152 = vmatpush3.msra.mxu0 %v45_v1  ;;  %v144_v6 = vld [vmem:[%s276_s2] ss:$0 sm:$0xff]  ;;  %s134_s25 = sshll.u32 %s241_s24, 4  ;;  %s135_s25 = int_to_ptr.vmem [resolvable:$true] %s134_s25 }
  0x1d   :  { %153 = vmatprep.subr.mxu0 %v239_v0  ;;  %s209_s26 = scalar_lea.vmem %s135_s25, 128  ;;  %p214_p11 = scmp.lt.s32.totalorder %s135_s25, %s135_s25 }
  0x1e   :  { %154 = vmatpush3.msra.mxu0 %v44_v2  ;;  %p210_p10 = scmp.ne.s32.totalorder %s135_s25, %s209_s26  ;;  %p215_p12 = scmp.lt.s32.totalorder %s209_s26, %s209_s26 }
  0x1f   :  { %155 = vmatprep.subr.mxu0 %v239_v0 }
  0x20   :  { %156 = vmatpush3.msra.mxu0 %v43_v3  ;;  %p216_p13 = por %p215_p12, %p214_p11 }
  0x21   :  { %157 = vmatprep.subr.mxu0 %v239_v0 }
  0x22   :  { %158 = vmatpush3.msra.mxu0 %v42_v4  ;;  %p217_p0 = pnand %p216_p13, %p210_p10 }
  0x23   :  { %160 = vmatmul.mubr.msk.f32.vlgmr.msra.gmra.mxu0 %vm53_vm1, %v41_v5 }
  0xe3   :  { %v123_v7 = vpop.f32.mrf.mxu0 }
  0xe4   :  { %v124_v8 = vadd.f32 %v144_v6, %v123_v7 }
  0xe5   :  { %v161_v9 = vpop.f32.mrf.mxu0 }
  0xe6   :  { %127 = vst [vmem:[#allocation7] sm:$0xff] %v124_v8 }
  0xe7   :  { %220 = shalt.err (!%p217_p0)
}
  0xe8   :  { %137 = dma.vmem_to_hbm [thread:$0]  %s135_s25, 128, %s277_s3, [#allocation4]  }
  0xe9   :  { %233 = dma.done.wait [#allocation4], 128  }
  0xea   :  { %234 = vsyncadd [#allocation4], 4294967168 }
  0xeb   :  { %141 = vsyncpa [#allocation3], 1 }
  0xec   :  { %142 = vsyncpa [#allocation6], 1 }
  0xed   :  { %143 = vsyncpa [#allocation4], 1 }

</bundles_post_ra>
